<compile_context>
chip_gen: v7x
topology: tpu7x:2x2x1
jax: 0.10.0
libtpu: 0.0.40
codegen_flags: <defaults>
</compile_context>

<pallas_src>
import functools

import jax
import jax.numpy as jnp
from jax.experimental import pallas as pl
from jax.experimental.pallas import tpu as pltpu

BN_EPS = 1e-5
_MIB = 1024 * 1024


def _round_up(v, m):
    return ((v + m - 1) // m) * m


# ---------------------------------------------------------------------------
# Kernel bodies
# ---------------------------------------------------------------------------

def _bn_stats_normalize(y, gamma, beta, inv_n, out_dtype):
    """Fused BN training-mode epilogue on an f32 (N, tile_cout) tile.

    One sweep for both axis-0 reductions (XLU), rsqrt on the EUP, then a single
    FMA pass: out = y * scale + (beta - mean * scale).  Sums are f32; var is
    clamped at 0 to guard the E[y^2] - mean^2 cancellation.
    """
    sum_y = jnp.sum(y, axis=0, keepdims=True)
    sum_yy = jnp.sum(y * y, axis=0, keepdims=True)
    mean = sum_y * inv_n
    var = jnp.maximum(sum_yy * inv_n - mean * mean, 0.0)
    scale = jax.lax.rsqrt(var + BN_EPS) * gamma
    shift = beta - mean * scale
    return (y * scale + shift).astype(out_dtype)


def _resident_kernel(x_ref, wt_ref, gamma_ref, beta_ref, out_ref, *, inv_n):
    # Grid = (Cout tiles,).  x is fully VMEM-resident (constant block index ->
    # fetched from HBM once); whole-K dot per Cout tile on the MXU.
    y = jnp.dot(x_ref[...], wt_ref[...], preferred_element_type=jnp.float32)
    out_ref[...] = _bn_stats_normalize(
        y, gamma_ref[...], beta_ref[...], inv_n, out_ref.dtype)


def _streamed_kernel(x_ref, wt_ref, gamma_ref, beta_ref, out_ref, *scratch,
                     inv_n, acc_in_out):
    # Grid = (Cout tiles ["parallel"], Cin tiles ["arbitrary" reduction, last]).
    acc_ref = out_ref if acc_in_out else scratch[0]
    k = pl.program_id(1)

    @pl.when(k == 0)
    def _init():
        acc_ref[...] = jnp.zeros_like(acc_ref)

    acc_ref[...] += jnp.dot(x_ref[...], wt_ref[...],
                            preferred_element_type=jnp.float32)

    @pl.when(k == pl.num_programs(1) - 1)
    def _finalize():
        out_ref[...] = _bn_stats_normalize(
            acc_ref[...], gamma_ref[...], beta_ref[...], inv_n, out_ref.dtype)


# ---------------------------------------------------------------------------
# One-time parameter preparation (hoisted out of the per-call path)
# ---------------------------------------------------------------------------

def prepare_bn_linear_params(w, gamma, beta, *, tile_cout=256, tile_cin=512):
    """Transpose W to a lane-dense (Cin, Cout) MXU RHS and zero-pad feature dims.

    Done once at init so the per-forward call does not pay an HBM read+write of
    the whole weight matrix for transpose/pad.
    """
    Cout, Cin = w.shape
    cin_128 = _round_up(Cin, 128)
    cout_128 = _round_up(Cout, 128)
    tile_cin = min(tile_cin, cin_128)          # multiples of 128 by construction
    tile_cout = min(tile_cout, cout_128)
    cin_p = _round_up(Cin, tile_cin)
    cout_p = _round_up(Cout, tile_cout)

    wt = jnp.transpose(w)                                          # (Cin, Cout)
    wt = jnp.pad(wt, ((0, cin_p - Cin), (0, cout_p - Cout)))
    # Padded output features: y=0, var=0 -> rsqrt(eps) finite with gamma=1,
    # beta=0; they are sliced away after the call.
    gamma_p = jnp.pad(gamma, (0, cout_p - Cout),
                      constant_values=1.0).reshape(1, cout_p)
    beta_p = jnp.pad(beta, (0, cout_p - Cout)).reshape(1, cout_p)
    return dict(wt=wt, gamma=gamma_p, beta=beta_p,
                cin=Cin, cout=Cout, cin_p=cin_p, cout_p=cout_p,
                tile_cin=tile_cin, tile_cout=tile_cout)


# ---------------------------------------------------------------------------
# Forward
# ---------------------------------------------------------------------------

def bn_linear(x, params, *, vmem_budget_bytes=48 * _MIB, force_streamed=False):
    """x: (N, Cin) -> (N, Cout).  `params` from prepare_bn_linear_params()."""
    N, Cin = x.shape
    assert Cin == params["cin"], "x feature dim mismatch"
    cin_p, cout_p = params["cin_p"], params["cout_p"]
    tile_cin, tile_cout = params["tile_cin"], params["tile_cout"]
    wt, gamma, beta = params["wt"], params["gamma"], params["beta"]

    if cin_p != Cin:
        # TODO(synk): a masked last-K tile would avoid this per-call activation pad.
        x = jnp.pad(x, ((0, 0), (0, cin_p - Cin)))

    out_dtype = x.dtype
    in_b = jnp.dtype(x.dtype).itemsize
    w_b = jnp.dtype(wt.dtype).itemsize
    out_b = jnp.dtype(out_dtype).itemsize
    inv_n = 1.0 / N
    acc_in_out = jnp.dtype(out_dtype) == jnp.dtype(jnp.float32)

    # VMEM footprints (conservative: every BlockSpec double-buffered).
    resident_need = (2 * N * cin_p * in_b               # x (resident)
                     + 2 * cin_p * tile_cout * w_b      # W.T
                     + 2 * N * tile_cout * out_b        # out
                     + 4 * tile_cout * w_b              # gamma, beta
                     + N * tile_cout * 4)               # f32 y temp
    streamed_need = (2 * N * tile_cin * in_b
                     + 2 * tile_cin * tile_cout * w_b
                     + 2 * N * tile_cout * out_b
                     + 4 * tile_cout * w_b
                     + (0 if acc_in_out else N * tile_cout * 4))

    use_resident = (not force_streamed) and (resident_need <= vmem_budget_bytes)

    if use_resident:
        grid = (cout_p // tile_cout,)
        kernel = functools.partial(_resident_kernel, inv_n=inv_n)
        in_specs = [
            pl.BlockSpec((N, cin_p), lambda j: (0, 0)),           # x, resident
            pl.BlockSpec((cin_p, tile_cout), lambda j: (0, j)),   # W.T
            pl.BlockSpec((1, tile_cout), lambda j: (0, j)),       # gamma
            pl.BlockSpec((1, tile_cout), lambda j: (0, j)),       # beta
        ]
        out_spec = pl.BlockSpec((N, tile_cout), lambda j: (0, j))
        scratch = []
        dims = ("parallel",)
        vmem_need = resident_need
        x_reads = 1
    else:
        grid = (cout_p // tile_cout, cin_p // tile_cin)
        kernel = functools.partial(_streamed_kernel, inv_n=inv_n,
                                   acc_in_out=acc_in_out)
        in_specs = [
            pl.BlockSpec((N, tile_cin), lambda j, k: (0, k)),         # x
            pl.BlockSpec((tile_cin, tile_cout), lambda j, k: (k, j)),  # W.T
            pl.BlockSpec((1, tile_cout), lambda j, k: (0, j)),        # gamma
            pl.BlockSpec((1, tile_cout), lambda j, k: (0, j)),        # beta
        ]
        out_spec = pl.BlockSpec((N, tile_cout), lambda j, k: (0, j))
        scratch = [] if acc_in_out else [pltpu.VMEM((N, tile_cout), jnp.float32)]
        dims = ("parallel", "arbitrary")
        vmem_need = streamed_need
        x_reads = grid[0]

    vmem_limit = min(max(int(vmem_need * 1.3), 32 * _MIB), 112 * _MIB)

    cost = pl.CostEstimate(
        flops=2 * N * cin_p * cout_p,
        transcendentals=cout_p,
        bytes_accessed=(N * cin_p * x_reads * in_b
                        + cin_p * cout_p * w_b
                        + 2 * cout_p * w_b
                        + N * cout_p * out_b),
    )

    out = pl.pallas_call(
        kernel,
        out_shape=jax.ShapeDtypeStruct((N, cout_p), out_dtype),
        grid_spec=pltpu.PrefetchScalarGridSpec(
            num_scalar_prefetch=0,
            grid=grid,
            in_specs=in_specs,
            out_specs=out_spec,
            scratch_shapes=scratch,
        ),
        compiler_params=pltpu.CompilerParams(
            dimension_semantics=dims,
            vmem_limit_bytes=vmem_limit,
        ),
        cost_estimate=cost,
    )(x, wt, gamma, beta)

    return out[:, :params["cout"]]


# ---------------------------------------------------------------------------
# Reference + self-test
# ---------------------------------------------------------------------------

def bn_linear_ref(x, w, b, gamma, beta):
    y = x.astype(jnp.float32) @ w.astype(jnp.float32).T + b.astype(jnp.float32)
    mu = y.mean(axis=0, keepdims=True)
    var = ((y - mu) ** 2).mean(axis=0, keepdims=True)
    return ((y - mu) / jnp.sqrt(var + BN_EPS) * gamma.astype(jnp.float32)
            + beta.astype(jnp.float32))


if __name__ == "__main__":
    key = jax.random.PRNGKey(0)
    kx, kw, kb, kg, kbe = jax.random.split(key, 5)

    # Small shapes that exercise Cin/Cout padding (160->256, 192->256).
    N, C_IN, C_OUT = 8, 160, 192
    x = jax.random.normal(kx, (N, C_IN), dtype=jnp.float32)
    w = jax.random.normal(kw, (C_OUT, C_IN), dtype=jnp.float32) * 0.1
    b = jax.random.normal(kb, (C_OUT,), dtype=jnp.float32) * 0.1
    gamma = 1.0 + 0.1 * jax.random.normal(kg, (C_OUT,), dtype=jnp.float32)
    beta = 0.1 * jax.random.normal(kbe, (C_OUT,), dtype=jnp.float32)

    # Reference includes the linear bias: it must cancel exactly in training-mode BN.
    ref = bn_linear_ref(x, w, b, gamma, beta)

    # 1) Default tiles -> x-resident, 1-D grid, whole-K dot.
    params = prepare_bn_linear_params(w, gamma, beta)
    out = jax.block_until_ready(bn_linear(x, params))
    assert out.shape == (N, C_OUT)
    assert jnp.allclose(out, ref, atol=1e-3, rtol=1e-3), "resident path mismatch"

    # 2) Small tiles + forced streamed path -> 2x2 grid, accumulate-into-out_ref,
    #    pl.when init/finalize.
    params_s = prepare_bn_linear_params(w, gamma, beta, tile_cout=128, tile_cin=128)
    out_s = jax.block_until_ready(bn_linear(x, params_s, force_streamed=True))
    assert jnp.allclose(out_s, ref, atol=1e-3, rtol=1e-3), "streamed path mismatch"

    # 3) bf16 inputs -> streamed path with the f32 scratch accumulator.
    xb = x.astype(jnp.bfloat16)
    wb = w.astype(jnp.bfloat16)
    gb = gamma.astype(jnp.bfloat16)
    bb = beta.astype(jnp.bfloat16)
    params_b = prepare_bn_linear_params(wb, gb, bb, tile_cout=128, tile_cin=128)
    out_b = jax.block_until_ready(bn_linear(xb, params_b, force_streamed=True))
    ref_b = bn_linear_ref(xb, wb, b.astype(jnp.bfloat16), gb, bb)
    assert jnp.allclose(out_b.astype(jnp.float32), ref_b, atol=5e-2, rtol=5e-2), \
        "bf16 path mismatch"

    print("KERNEL_OK")
</pallas_src>

<mosaic_0001>
module attributes {stable_mosaic.version = 11 : i64} {
  func.func @_resident_kernel(%arg0: i32, %arg1: memref<8x256xf32, #tpu.memory_space<vmem>>, %arg2: memref<256x256xf32, #tpu.memory_space<vmem>>, %arg3: memref<1x256xf32, #tpu.memory_space<vmem>>, %arg4: memref<1x256xf32, #tpu.memory_space<vmem>>, %arg5: memref<8x256xf32, #tpu.memory_space<vmem>>) attributes {dimension_semantics = [#tpu.dimension_semantics<parallel>], iteration_bounds = array<i64: 1>, scalar_prefetch = 0 : i64, scratch_operands = 0 : i64, tpu.core_type = #tpu.core_type<tc>, window_params = [{pipeline_mode = #tpu.pipeline_mode<synchronous>, transform_indices = @transform_0, window_bounds = array<i64: 8, 256>}, {transform_indices = @transform_1, window_bounds = array<i64: 256, 256>}, {transform_indices = @transform_2, window_bounds = array<i64: 1, 256>}, {transform_indices = @transform_3, window_bounds = array<i64: 1, 256>}, {transform_indices = @transform_4, window_bounds = array<i64: 8, 256>}]} {
    %c0 = arith.constant 0 : index
    %c0_0 = arith.constant 0 : index
    %0 = vector.load %arg1[%c0, %c0_0] : memref<8x256xf32, #tpu.memory_space<vmem>>, vector<8x256xf32>
    %c0_1 = arith.constant 0 : index
    %c0_2 = arith.constant 0 : index
    %1 = vector.load %arg2[%c0_1, %c0_2] : memref<256x256xf32, #tpu.memory_space<vmem>>, vector<256x256xf32>
    %cst = arith.constant dense<0.000000e+00> : vector<8x256xf32>
    %2 = tpu.matmul %0, %1, %cst {dimension_numbers = #tpu.dot_dimension_numbers<[1], [0], [0], [1], [0, 0, 1, 1], [], []>} : vector<8x256xf32>, vector<256x256xf32>, vector<8x256xf32> -> vector<8x256xf32>
    %c0_3 = arith.constant 0 : index
    %c0_4 = arith.constant 0 : index
    %3 = vector.load %arg3[%c0_3, %c0_4] : memref<1x256xf32, #tpu.memory_space<vmem>>, vector<1x256xf32>
    %c0_5 = arith.constant 0 : index
    %c0_6 = arith.constant 0 : index
    %4 = vector.load %arg4[%c0_5, %c0_6] : memref<1x256xf32, #tpu.memory_space<vmem>>, vector<1x256xf32>
    %cst_7 = arith.constant dense<0.000000e+00> : vector<256xf32>
    %5 = vector.multi_reduction <add>, %2, %cst_7 [0] : vector<8x256xf32> to vector<256xf32>
    %6 = vector.shape_cast %5 : vector<256xf32> to vector<1x256xf32>
    %7 = arith.mulf %2, %2 : vector<8x256xf32>
    %cst_8 = arith.constant dense<0.000000e+00> : vector<256xf32>
    %8 = vector.multi_reduction <add>, %7, %cst_8 [0] : vector<8x256xf32> to vector<256xf32>
    %9 = vector.shape_cast %8 : vector<256xf32> to vector<1x256xf32>
    %cst_9 = arith.constant 1.250000e-01 : f32
    %10 = vector.broadcast %cst_9 : f32 to vector<1x256xf32>
    %11 = arith.mulf %6, %10 : vector<1x256xf32>
    %cst_10 = arith.constant 1.250000e-01 : f32
    %12 = vector.broadcast %cst_10 : f32 to vector<1x256xf32>
    %13 = arith.mulf %9, %12 : vector<1x256xf32>
    %14 = arith.mulf %11, %11 : vector<1x256xf32>
    %15 = arith.subf %13, %14 : vector<1x256xf32>
    %cst_11 = arith.constant 0.000000e+00 : f32
    %16 = vector.broadcast %cst_11 : f32 to vector<1x256xf32>
    %17 = arith.maximumf %15, %16 : vector<1x256xf32>
    %cst_12 = arith.constant 9.99999974E-6 : f32
    %18 = vector.broadcast %cst_12 : f32 to vector<1x256xf32>
    %19 = arith.addf %17, %18 : vector<1x256xf32>
    %20 = math.rsqrt %19 : vector<1x256xf32>
    %21 = arith.mulf %20, %3 : vector<1x256xf32>
    %22 = arith.mulf %11, %21 : vector<1x256xf32>
    %23 = arith.subf %4, %22 : vector<1x256xf32>
    %24 = vector.broadcast %21 : vector<1x256xf32> to vector<8x256xf32>
    %25 = arith.mulf %2, %24 : vector<8x256xf32>
    %26 = vector.broadcast %23 : vector<1x256xf32> to vector<8x256xf32>
    %27 = arith.addf %25, %26 : vector<8x256xf32>
    %c0_13 = arith.constant 0 : index
    %c0_14 = arith.constant 0 : index
    %28 = vector.load %arg5[%c0_13, %c0_14] : memref<8x256xf32, #tpu.memory_space<vmem>>, vector<8x256xf32>
    tpu.vector_store %arg5[%c0_13, %c0_14], %27 {strides = array<i32>} : memref<8x256xf32, #tpu.memory_space<vmem>>, vector<8x256xf32>,
    return
  }
  func.func @transform_0(%arg0: i32) -> (i32, i32) {
    %c0_i32 = arith.constant 0 : i32
    %c0_i32_0 = arith.constant 0 : i32
    %c0_i32_1 = arith.constant 0 : i32
    return %c0_i32, %c0_i32_0 : i32, i32
  }
  func.func @transform_1(%arg0: i32) -> (i32, i32) {
    %c0_i32 = arith.constant 0 : i32
    %c0_i32_0 = arith.constant 0 : i32
    return %c0_i32, %arg0 : i32, i32
  }
  func.func @transform_2(%arg0: i32) -> (i32, i32) {
    %c0_i32 = arith.constant 0 : i32
    %c0_i32_0 = arith.constant 0 : i32
    return %c0_i32, %arg0 : i32, i32
  }
  func.func @transform_3(%arg0: i32) -> (i32, i32) {
    %c0_i32 = arith.constant 0 : i32
    %c0_i32_0 = arith.constant 0 : i32
    return %c0_i32, %arg0 : i32, i32
  }
  func.func @transform_4(%arg0: i32) -> (i32, i32) {
    %c0_i32 = arith.constant 0 : i32
    %c0_i32_0 = arith.constant 0 : i32
    return %c0_i32, %arg0 : i32, i32
  }
}

</mosaic_0001>

<bundles_post_ra>
// kernel: tpu_custom_call.1
= control target key start
LH: loop header
LB: loop body
LE: loop exit
PB: predicated region body
PF: predicated region fallthrough
CT: control target
= control target key end

     0   :  { %9 = vsyncpa [#allocation3], 0  ;;  %s538_s0 = inlined_call_operand.hbm [shape: f32[8,256], index: 0, kind: input, shape index: {}]   ;;  %s539_s1 = inlined_call_operand.hbm [shape: f32[256,256], index: 1, kind: input, shape index: {}]   ;;  %s540_s2 = inlined_call_operand.vmem [shape: f32[1,256], index: 2, kind: input, shape index: {}]   ;;  %s541_s3 = inlined_call_operand.vmem [shape: f32[1,256], index: 3, kind: input, shape index: {}]   ;;  %s542_s4 = inlined_call_operand.hbm [shape: f32[8,256], index: 4, kind: output, shape index: {}]  }
   0x1   :  { %10 = vsyncpa [#allocation6], 0 }
   0x2   :  { %11 = vsyncpa [#allocation4], 0  ;;  %s444_s15 = smov [#allocation2]   ;;  %s445_s17 = smov [#allocation5]  }
   0x3   :  { %s18_s16 = sshll.u32 %s444_s15, 4  ;;  %s27_s18 = sshll.u32 %s445_s17, 4  ;;  %s19_s16 = int_to_ptr.vmem [resolvable:$true] %s18_s16  ;;  %s475_s18 = int_to_ptr.vmem [resolvable:$true] %s27_s18 }
   0x4   :  { %s372_s21 = scalar_lea.hbm %s538_s0, 256 }
   0x5   :  { %p373_p0 = scmp.ne.s32.totalorder %s538_s0, %s372_s21  ;;  %p376_p1 = scmp.lt.u32.totalorder %s372_s21, %s538_s0 }
   0x7   :  { %p378_p2 = pnand %p376_p1, %p373_p0 }
   0x9   :  { %381 = shalt.err (!%p378_p2)
}
   0xa   :  { %s382_s26 = scalar_lea.vmem %s19_s16, 256  ;;  %p387_p4 = scmp.lt.s32.totalorder %s19_s16, %s19_s16 }
   0xb   :  { %p383_p3 = scmp.ne.s32.totalorder %s19_s16, %s382_s26  ;;  %p388_p5 = scmp.lt.s32.totalorder %s382_s26, %s382_s26 }
   0xd   :  { %p389_p6 = por %p388_p5, %p387_p4 }
   0xf   :  { %p390_p7 = pnand %p389_p6, %p383_p3 }
  0x11   :  { %393 = shalt.err (!%p390_p7)
}
  0x12   :  { %21 = dma.hbm_to_vmem [thread:$0]  %s538_s0, 256, %s19_s16, [#allocation3]  }
  0x13   :  { %s394_s5 = scalar_lea.hbm %s539_s1, 8192 }
  0x14   :  { %p395_p8 = scmp.ne.s32.totalorder %s539_s1, %s394_s5  ;;  %p398_p9 = scmp.lt.u32.totalorder %s394_s5, %s539_s1 }
  0x16   :  { %p400_p10 = pnand %p398_p9, %p395_p8 }
  0x18   :  { %403 = shalt.err (!%p400_p10)
}
  0x19   :  { %s404_s10 = scalar_lea.vmem %s475_s18, 8192  ;;  %p409_p12 = scmp.lt.s32.totalorder %s475_s18, %s475_s18 }
  0x1a   :  { %p405_p11 = scmp.ne.s32.totalorder %s475_s18, %s404_s10  ;;  %p410_p13 = scmp.lt.s32.totalorder %s404_s10, %s404_s10 }
  0x1c   :  { %p411_p0 = por %p410_p13, %p409_p12 }
  0x1e   :  { %p412_p1 = pnand %p411_p0, %p405_p11 }
  0x20   :  { %415 = shalt.err (!%p412_p1)
}
  0x21   :  { %s446_s0 = smov 256   ;;  %s447_s11 = smov 16  }
  0x22   :  { %33 = dma.hbm_to_vmem [thread:$0]  %s539_s1, 8192, %s475_s18, [#allocation6], %s446_s0, %s446_s0, %s447_s11  }
  0x23   :  { %438 = dma.done.wait [#allocation3], 256  }
  0x24   :  { %439 = vsyncadd [#allocation3], 4294967040 }
  0x25   :  { %440 = dma.done.wait [#allocation6], 8192  }
  0x26   :  { %441 = vsyncadd [#allocation6], 4294959104  ;;  %v47_v0 = vld [vmem:[#allocation5 + $0x8] sm:$0xff]  ;;  %v49_v1 = vld [vmem:[#allocation5 + $0x18] sm:$0xff] }
  0x27   :  { %v46_v2 = vld [vmem:[#allocation5] sm:$0xff]  ;;  %v298_v3 = vpack.c.bf16 %v49_v1, %v47_v0  ;;  %v48_v4 = vld [vmem:[#allocation5 + $0x10] sm:$0xff]  ;;  %v51_v5 = vld [vmem:[#allocation5 + $0x28] sm:$0xff] }
  0x28   :  { %v53_v6 = vld [vmem:[#allocation5 + $0x38] sm:$0xff]  ;;  %v300_v7 = vpack.c.bf16 %v48_v4, %v46_v2  ;;  %v50_v9 = vld [vmem:[#allocation5 + $0x20] sm:$0xff]  ;;  %v52_v10 = vld [vmem:[#allocation5 + $0x30] sm:$0xff] }
  0x29   :  { %v302_v8 = vpack.c.bf16 %v53_v6, %v51_v5  ;;  %v55_v11 = vld [vmem:[#allocation5 + $0x48] sm:$0xff]  ;;  %299 = vmatprep.subr.bf16.mxu0 %v298_v3  ;;  %v57_v12 = vld [vmem:[#allocation5 + $0x58] sm:$0xff]  ;;  %v304_v13 = vpack.c.bf16 %v52_v10, %v50_v9  ;;  %v54_v15 = vld [vmem:[#allocation5 + $0x40] sm:$0xff] }
  0x2a   :  { %301 = vmatpush1.bf16.msra.mxu0 %v300_v7  ;;  %v306_v14 = vpack.c.bf16 %v57_v12, %v55_v11  ;;  %v56_v16 = vld [vmem:[#allocation5 + $0x50] sm:$0xff]  ;;  %v59_v17 = vld [vmem:[#allocation5 + $0x68] sm:$0xff]  ;;  %v61_v18 = vld [vmem:[#allocation5 + $0x78] sm:$0xff] }
  0x2b   :  { %303 = vmatprep.subr.bf16.mxu0 %v302_v8  ;;  %v308_v19 = vpack.c.bf16 %v56_v16, %v54_v15  ;;  %v310_v20 = vpack.c.bf16 %v61_v18, %v59_v17  ;;  %v58_v21 = vld [vmem:[#allocation5 + $0x60] sm:$0xff]  ;;  %v60_v22 = vld [vmem:[#allocation5 + $0x70] sm:$0xff]  ;;  %v63_v23 = vld [vmem:[#allocation5 + $0x88] sm:$0xff] }
  0x2c   :  { %v65_v24 = vld [vmem:[#allocation5 + $0x98] sm:$0xff]  ;;  %v312_v25 = vpack.c.bf16 %v60_v22, %v58_v21  ;;  %v62_v27 = vld [vmem:[#allocation5 + $0x80] sm:$0xff]  ;;  %v64_v28 = vld [vmem:[#allocation5 + $0x90] sm:$0xff] }
  0x2d   :  { %v314_v26 = vpack.c.bf16 %v65_v24, %v63_v23  ;;  %v67_v29 = vld [vmem:[#allocation5 + $0xa8] sm:$0xff]  ;;  %v69_v30 = vld [vmem:[#allocation5 + $0xb8] sm:$0xff]  ;;  %v316_v31 = vpack.c.bf16 %v64_v28, %v62_v27  ;;  %v66_v33 = vld [vmem:[#allocation5 + $0xa0] sm:$0xff] }
  0x2e   :  { %305 = vmatpush1.bf16.msra.mxu0 %v304_v13  ;;  %v318_v32 = vpack.c.bf16 %v69_v30, %v67_v29  ;;  %v68_v34 = vld [vmem:[#allocation5 + $0xb0] sm:$0xff]  ;;  %v71_v35 = vld [vmem:[#allocation5 + $0xc8] sm:$0xff]  ;;  %v73_v36 = vld [vmem:[#allocation5 + $0xd8] sm:$0xff] }
  0x2f   :  { %307 = vmatprep.subr.bf16.mxu0 %v306_v14  ;;  %v320_v37 = vpack.c.bf16 %v68_v34, %v66_v33  ;;  %v322_v38 = vpack.c.bf16 %v73_v36, %v71_v35  ;;  %v70_v39 = vld [vmem:[#allocation5 + $0xc0] sm:$0xff]  ;;  %v72_v40 = vld [vmem:[#allocation5 + $0xd0] sm:$0xff]  ;;  %v45_v41 = vld [vmem:[#allocation2 + $0x8] sm:$0xff] }
  0x30   :  { %v75_v42 = vld [vmem:[#allocation5 + $0xe8] sm:$0xff]  ;;  %v77_v43 = vld [vmem:[#allocation5 + $0xf8] sm:$0xff]  ;;  %174 = vmatprep.mubr.f32.mxu0 %v45_v41  ;;  %v324_v44 = vpack.c.bf16 %v72_v40, %v70_v39  ;;  %v74_v46 = vld [vmem:[#allocation5 + $0xe0] sm:$0xff] }
  0x31   :  { %v326_v45 = vpack.c.bf16 %v77_v43, %v75_v42  ;;  %v76_v47 = vld [vmem:[#allocation5 + $0xf0] sm:$0xff]  ;;  %v79_v48 = vld [vmem:[#allocation5 + $0x108] sm:$0xff]  ;;  %v81_v49 = vld [vmem:[#allocation5 + $0x118] sm:$0xff] }
  0x32   :  { %309 = vmatpush1.bf16.msra.mxu0 %v308_v19  ;;  %v328_v50 = vpack.c.bf16 %v76_v47, %v74_v46  ;;  %v330_v51 = vpack.c.bf16 %v81_v49, %v79_v48  ;;  %v78_v52 = vld [vmem:[#allocation5 + $0x100] sm:$0xff]  ;;  %v80_v53 = vld [vmem:[#allocation5 + $0x110] sm:$0xff]  ;;  %v83_v54 = vld [vmem:[#allocation5 + $0x128] sm:$0xff] }
  0x33   :  { %311 = vmatprep.subr.bf16.mxu0 %v310_v20  ;;  %v85_v55 = vld [vmem:[#allocation5 + $0x138] sm:$0xff]  ;;  %v332_v56 = vpack.c.bf16 %v80_v53, %v78_v52  ;;  %v82_v58 = vld [vmem:[#allocation5 + $0x120] sm:$0xff]  ;;  %v84_v59 = vld [vmem:[#allocation5 + $0x130] sm:$0xff] }
  0x34   :  { %v334_v57 = vpack.c.bf16 %v85_v55, %v83_v54  ;;  %v87_v60 = vld [vmem:[#allocation5 + $0x148] sm:$0xff]  ;;  %v89_v61 = vld [vmem:[#allocation5 + $0x158] sm:$0xff]  ;;  %v336_v62 = vpack.c.bf16 %v84_v59, %v82_v58  ;;  %v86_v0 = vld [vmem:[#allocation5 + $0x140] sm:$0xff] }
  0x35   :  { %v338_v63 = vpack.c.bf16 %v89_v61, %v87_v60  ;;  %v88_v1 = vld [vmem:[#allocation5 + $0x150] sm:$0xff]  ;;  %v91_v2 = vld [vmem:[#allocation5 + $0x168] sm:$0xff]  ;;  %v93_v3 = vld [vmem:[#allocation5 + $0x178] sm:$0xff] }
  0x36   :  { %313 = vmatpush1.bf16.msra.mxu0 %v312_v25  ;;  %v340_v4 = vpack.c.bf16 %v88_v1, %v86_v0  ;;  %v342_v5 = vpack.c.bf16 %v93_v3, %v91_v2  ;;  %v90_v6 = vld [vmem:[#allocation5 + $0x160] sm:$0xff]  ;;  %v92_v7 = vld [vmem:[#allocation5 + $0x170] sm:$0xff]  ;;  %v95_v8 = vld [vmem:[#allocation5 + $0x188] sm:$0xff] }
  0x37   :  { %315 = vmatprep.subr.bf16.mxu0 %v314_v26  ;;  %v97_v9 = vld [vmem:[#allocation5 + $0x198] sm:$0xff]  ;;  %v344_v10 = vpack.c.bf16 %v92_v7, %v90_v6  ;;  %v94_v12 = vld [vmem:[#allocation5 + $0x180] sm:$0xff]  ;;  %v96_v13 = vld [vmem:[#allocation5 + $0x190] sm:$0xff] }
  0x38   :  { %v346_v11 = vpack.c.bf16 %v97_v9, %v95_v8  ;;  %v99_v14 = vld [vmem:[#allocation5 + $0x1a8] sm:$0xff]  ;;  %v101_v15 = vld [vmem:[#allocation5 + $0x1b8] sm:$0xff]  ;;  %v348_v16 = vpack.c.bf16 %v96_v13, %v94_v12  ;;  %v98_v18 = vld [vmem:[#allocation5 + $0x1a0] sm:$0xff] }
  0x39   :  { %v350_v17 = vpack.c.bf16 %v101_v15, %v99_v14  ;;  %v100_v19 = vld [vmem:[#allocation5 + $0x1b0] sm:$0xff]  ;;  %v103_v20 = vld [vmem:[#allocation5 + $0x1c8] sm:$0xff]  ;;  %v105_v21 = vld [vmem:[#allocation5 + $0x1d8] sm:$0xff]  ;;  %v448_v15 = vmov 1966171168  }
  0x3a   :  { %317 = vmatpush1.bf16.msra.mxu0 %v316_v31  ;;  %v352_v22 = vpack.c.bf16 %v100_v19, %v98_v18  ;;  %v354_v23 = vpack.c.bf16 %v105_v21, %v103_v20  ;;  %v102_v24 = vld [vmem:[#allocation5 + $0x1c0] sm:$0xff]  ;;  %v104_v25 = vld [vmem:[#allocation5 + $0x1d0] sm:$0xff]  ;;  %v107_v26 = vld [vmem:[#allocation5 + $0x1e8] sm:$0xff] }
  0x3b   :  { %319 = vmatprep.subr.bf16.mxu0 %v318_v32  ;;  %v109_v27 = vld [vmem:[#allocation5 + $0x1f8] sm:$0xff]  ;;  %v356_v28 = vpack.c.bf16 %v104_v25, %v102_v24  ;;  %v106_v30 = vld [vmem:[#allocation5 + $0x1e0] sm:$0xff]  ;;  %v108_v31 = vld [vmem:[#allocation5 + $0x1f0] sm:$0xff] }
  0x3c   :  { %v358_v29 = vpack.c.bf16 %v109_v27, %v107_v26  ;;  %v360_v32 = vpack.c.bf16 %v108_v31, %v106_v30  ;;  %v44_v33 = vld [vmem:[#allocation2] sm:$0xff] }
  0x3d   :  { %v181_v13 = vld [vmem:[%s540_s2] sm:$0x3]  ;;  %s449_s2 = smov [#allocation7]  }
  0x3e   :  { %321 = vmatpush1.bf16.msra.mxu0 %v320_v37  ;;  %s288_s17 = sshll.u32 %s449_s2, 4  ;;  %s289_s17 = int_to_ptr.vmem [resolvable:$true] %s288_s17 }
  0x3f   :  { %323 = vmatprep.subr.bf16.mxu0 %v322_v38  ;;  %s416_s18 = scalar_lea.vmem %s289_s17, 256  ;;  %p421_p3 = scmp.lt.s32.totalorder %s289_s17, %s289_s17 }
  0x40   :  { %p417_p2 = scmp.ne.s32.totalorder %s289_s17, %s416_s18  ;;  %p422_p4 = scmp.lt.s32.totalorder %s416_s18, %s416_s18 }
  0x42   :  { %325 = vmatpush1.bf16.msra.mxu0 %v324_v44  ;;  %p423_p5 = por %p422_p4, %p421_p3 }
  0x43   :  { %327 = vmatprep.subr.bf16.mxu0 %v326_v45 }
  0x44   :  { %p424_p6 = pnand %p423_p5, %p417_p2 }
  0x46   :  { %329 = vmatpush1.bf16.msra.mxu0 %v328_v50 }
  0x47   :  { %331 = vmatprep.subr.bf16.mxu0 %v330_v51 }
  0x4a   :  { %333 = vmatpush1.bf16.msra.mxu0 %v332_v56 }
  0x4b   :  { %335 = vmatprep.subr.bf16.mxu0 %v334_v57 }
  0x4e   :  { %337 = vmatpush1.bf16.msra.mxu0 %v336_v62 }
  0x4f   :  { %339 = vmatprep.subr.bf16.mxu0 %v338_v63 }
  0x52   :  { %341 = vmatpush1.bf16.msra.mxu0 %v340_v4 }
  0x53   :  { %343 = vmatprep.subr.bf16.mxu0 %v342_v5  ;;  %v224_v5 = vlaneseq }
  0x56   :  { %345 = vmatpush1.bf16.msra.mxu0 %v344_v10  ;;  %v225_v10 = vshrl.u32 %v224_v5, 7 }
  0x57   :  { %347 = vmatprep.subr.bf16.mxu0 %v346_v11 }
  0x58   :  { %v226_v12 = vsub.s32 0, %v225_v10  ;;  %v230_v14 = vsub.s32 1, %v225_v10 }
  0x5a   :  { %349 = vmatpush1.bf16.msra.mxu0 %v348_v16  ;;  %v242_v16 = vunpack.c.l.s4 %v448_v15  ;;  %v231_v18 = vrot.slane %v181_v13, %v230_v14 }
  0x5b   :  { %351 = vmatprep.subr.bf16.mxu0 %v350_v17  ;;  %v227_v17 = vrot.slane %v181_v13, %v226_v12 }
  0x5c   :  { %v243_v20 = vunpack.c.0.s8 %v242_v16 }
  0x5e   :  { %353 = vmatpush1.bf16.msra.mxu0 %v352_v22  ;;  %v246_v26 = vsub.s32 %v243_v20, %v225_v10 }
  0x5f   :  { %355 = vmatprep.subr.bf16.mxu0 %v354_v23 }
  0x62   :  { %357 = vmatpush1.bf16.msra.mxu0 %v356_v28 }
  0x63   :  { %359 = vmatprep.subr.bf16.mxu0 %v358_v29  ;;  %v182_v29 = vld [vmem:[%s541_s3] sm:$0x3] }
  0x66   :  { %361 = vmatpush1.bf16.msra.mxu0 %v360_v32 }
  0x69   :  { %175 = vmatmul.mubr.f32.vlgmr.msra.gmra.mrb[0].mxu0 %v44_v33 }
 0x13c   :  { %v506_v34 = vpop.f32.mrb[0].mxu0 }
 0x13d   :  { %v183_v35 = vrot.slane %v506_v34, 4  ;;  %v195_v36 = vmul.f32 %v506_v34, %v506_v34  ;;  %v511_v37 = vpop.f32.mrb[1].mxu0 }
 0x13e   :  { %v189_v38 = vrot.slane %v511_v37, 4  ;;  %v196_v39 = vmul.f32 %v511_v37, %v511_v37 }
 0x13f   :  { %v184_v40 = vadd.f32 %v183_v35, %v506_v34  ;;  %v197_v41 = vrot.slane %v195_v36, 4 }
 0x140   :  { %v190_v42 = vadd.f32 %v189_v38, %v511_v37  ;;  %v203_v43 = vrot.slane %v196_v39, 4 }
 0x141   :  { %v185_v44 = vrot.slane %v184_v40, 2  ;;  %v198_v45 = vadd.f32 %v197_v41, %v195_v36 }
 0x142   :  { %v191_v46 = vrot.slane %v190_v42, 2  ;;  %v204_v47 = vadd.f32 %v203_v43, %v196_v39 }
 0x143   :  { %v186_v48 = vadd.f32 %v185_v44, %v184_v40  ;;  %v199_v49 = vrot.slane %v198_v45, 2 }
 0x144   :  { %v192_v50 = vadd.f32 %v191_v46, %v190_v42  ;;  %v205_v51 = vrot.slane %v204_v47, 2 }
 0x145   :  { %v187_v52 = vrot.slane %v186_v48, 1  ;;  %v200_v53 = vadd.f32 %v199_v49, %v198_v45 }
 0x146   :  { %v193_v54 = vrot.slane %v192_v50, 1  ;;  %v206_v55 = vadd.f32 %v205_v51, %v204_v47 }
 0x147   :  { %v188_v56 = vadd.f32 %v187_v52, %v186_v48  ;;  %v201_v57 = vrot.slane %v200_v53, 1 }
 0x148   :  { %v194_v58 = vadd.f32 %v193_v54, %v192_v50  ;;  %v207_v59 = vrot.slane %v206_v55, 1 }
 0x149   :  { %v202_v60 = vadd.f32 %v201_v57, %v200_v53  ;;  %v209_v61 = vmul.f32 0.125, %v188_v56 }
 0x14a   :  { %v208_v62 = vadd.f32 %v207_v59, %v206_v55  ;;  %v210_v63 = vmul.f32 0.125, %v194_v58 }
 0x14b   :  { %v211_v0 = vmul.f32 0.125, %v202_v60  ;;  %v213_v1 = vmul.f32 %v209_v61, %v209_v61 }
 0x14c   :  { %v212_v2 = vmul.f32 0.125, %v208_v62  ;;  %v214_v3 = vmul.f32 %v210_v63, %v210_v63 }
 0x14d   :  { %v215_v4 = vsub.f32 %v211_v0, %v213_v1 }
 0x14e   :  { %v216_v6 = vsub.f32 %v212_v2, %v214_v3 }
 0x14f   :  { %v217_v7 = vmax.f32 %v215_v4, 0.0 }
 0x150   :  { %v218_v8 = vmax.f32 %v216_v6, 0.0 }
 0x151   :  { %v219_v9 = vadd.f32 1e-05, %v217_v7 }
 0x152   :  { %v220_v11 = vadd.f32 1e-05, %v218_v8 }
 0x153   :  { %368 = vrsqrt.f32 %v219_v9 }
 0x154   :  { %370 = vrsqrt.f32 %v220_v11 }
 0x15d   :  { %v369_v19 = vpop.eup %368 }
 0x15e   :  { %v371_v21 = vpop.eup %370  ;;  %v234_v22 = vmul.f32 %v369_v19, %v227_v17 }
 0x15f   :  { %v235_v23 = vmul.f32 %v371_v21, %v231_v18 }
 0x160   :  { %v236_v24 = vmul.f32 %v234_v22, %v209_v61  ;;  %v260_v30 = vrot.slane %v234_v22, %v226_v12 }
 0x161   :  { %v237_v25 = vmul.f32 %v235_v23, %v210_v63  ;;  %v264_v31 = vrot.slane %v235_v23, %v226_v12 }
 0x162   :  { %v265_v35 = vmul.f32 %v260_v30, %v506_v34 }
 0x163   :  { %v240_v27 = vcombine.low %v236_v24, %v237_v25  ;;  %v266_v36 = vmul.f32 %v264_v31, %v511_v37 }
 0x165   :  { %v247_v28 = vrot.slane %v240_v27, %v246_v26 }
 0x167   :  { %v254_v32 = vrot.slane %v247_v28, %v246_v26 }
 0x169   :  { %v256_v33 = vsub.f32 %v182_v29, %v254_v32 }
 0x16b   :  { %v271_v38 = vrot.slane %v256_v33, %v226_v12  ;;  %v275_v39 = vrot.slane %v256_v33, %v230_v14 }
 0x16d   :  { %v278_v40 = vadd.f32 %v271_v38, %v265_v35  ;;  %v279_v41 = vadd.f32 %v275_v39, %v266_v36 }
 0x16f   :  { %280 = vst [vmem:[#allocation7] sm:$0xff] %v278_v40  ;;  %281 = vst [vmem:[#allocation7 + $0x8] sm:$0xff] %v279_v41 }
 0x170   :  { %427 = shalt.err (!%p424_p6)
}
 0x171   :  { %s428_s20 = scalar_lea.hbm %s542_s4, 256 }
 0x172   :  { %p429_p7 = scmp.ne.s32.totalorder %s542_s4, %s428_s20  ;;  %p432_p8 = scmp.lt.u32.totalorder %s428_s20, %s542_s4 }
 0x174   :  { %p434_p9 = pnand %p432_p8, %p429_p7 }
 0x176   :  { %437 = shalt.err (!%p434_p9)
}
 0x177   :  { %291 = dma.vmem_to_hbm [thread:$0]  %s289_s17, 256, %s542_s4, [#allocation4]  }
 0x178   :  { %442 = dma.done.wait [#allocation4], 256  }
 0x179   :  { %443 = vsyncadd [#allocation4], 4294967040 }
 0x17a   :  { %295 = vsyncpa [#allocation3], 1 }
 0x17b   :  { %296 = vsyncpa [#allocation6], 1 }
 0x17c   :  { %297 = vsyncpa [#allocation4], 1 }

</bundles_post_ra>
